<compile_context>
chip_gen: v5e
topology: v5e:2x2
jax: 0.10.0
libtpu: 0.0.40
codegen_flags: <defaults>
</compile_context>

<pallas_src>
import functools

import jax
import jax.numpy as jnp
from jax.experimental import pallas as pl
from jax.experimental.pallas import tpu as pltpu

_LANES = 128
_SUBLANES = 8


def _rmse_kernel(yhat_ref, y_ref, out_ref, acc_ref, *,
                 total_n, total_rows, block_rows, ragged):
    """Accumulates per-(sublane, lane) partial sums of squared differences."""
    i = pl.program_id(0)

    @pl.when(i == 0)
    def _init():
        acc_ref[...] = jnp.zeros_like(acc_ref)

    d = yhat_ref[...].astype(jnp.float32) - y_ref[...].astype(jnp.float32)

    if ragged:
        # The last grid block can extend past the array; its out-of-bounds VMEM
        # region holds garbage, so mask whole rows by global row index (padding
        # already guarantees every valid row is full).  int32 row index is safe
        # for anything that fits in HBM, unlike a flat element index.
        row = jax.lax.broadcasted_iota(jnp.int32, (block_rows, _LANES), 0)
        global_row = i * block_rows + row
        d = jnp.where(global_row < total_rows, d, jnp.float32(0.0))

    sq = d * d
    # Fold the block's sublane groups onto one vreg: pure vector adds, no XLU
    # reduce and no scalar read-modify-write on the critical path.
    acc_ref[...] += sq.reshape(block_rows // _SUBLANES, _SUBLANES, _LANES).sum(axis=0)

    @pl.when(i == pl.num_programs(0) - 1)
    def _finalize():
        total = jnp.sum(acc_ref[...])  # single cross-lane/sublane reduce, once
        out_ref[...] = jnp.sqrt(total / jnp.float32(total_n)).reshape(1, 1)


def rmse_loss(yhat, y, *, block_rows=4096):
    """Pallas implementation of torch.sqrt(nn.MSELoss()(yhat, y))."""
    assert yhat.shape == y.shape, "broadcasting not required for RMSELoss usage"
    total_n = yhat.size

    # Keep native dtype; the kernel upcasts to f32 on the fly.
    yf = yhat.reshape(-1)
    xf = y.reshape(-1)

    # Minimal second-minor alignment for the narrower of the two input dtypes
    # (f32 -> 8 rows, bf16/f16 -> 16, 8-bit -> 32).
    itemsize = min(jnp.dtype(yf.dtype).itemsize, jnp.dtype(xf.dtype).itemsize)
    row_align = {4: 8, 2: 16, 1: 32}.get(int(itemsize), 8)
    align_elems = row_align * _LANES

    padded_n = pl.cdiv(total_n, align_elems) * align_elems
    if padded_n != total_n:
        # Rare path (element count not a multiple of the minimal tile).  The
        # identical zero padding contributes 0 to the squared-error sum.
        pad = padded_n - total_n
        yf = jnp.pad(yf, (0, pad))
        xf = jnp.pad(xf, (0, pad))

    rows = padded_n // _LANES
    yf = yf.reshape(rows, _LANES)
    xf = xf.reshape(rows, _LANES)

    # Big, aligned tiles; clamp to the actual number of rows.
    block_rows = max(row_align, min(int(block_rows), rows))
    block_rows -= block_rows % row_align
    grid_len = pl.cdiv(rows, block_rows)
    ragged = (rows % block_rows) != 0

    bytes_accessed = (
        yhat.size * jnp.dtype(yhat.dtype).itemsize
        + y.size * jnp.dtype(y.dtype).itemsize
        + 4
    )
    cost = pl.CostEstimate(
        flops=3 * total_n, transcendentals=1, bytes_accessed=bytes_accessed
    )

    out = pl.pallas_call(
        functools.partial(
            _rmse_kernel,
            total_n=total_n,
            total_rows=rows,
            block_rows=block_rows,
            ragged=ragged,
        ),
        out_shape=jax.ShapeDtypeStruct((1, 1), jnp.float32),
        grid_spec=pltpu.PrefetchScalarGridSpec(
            num_scalar_prefetch=0,
            grid=(grid_len,),
            in_specs=[
                pl.BlockSpec((block_rows, _LANES), lambda i: (i, 0)),
                pl.BlockSpec((block_rows, _LANES), lambda i: (i, 0)),
            ],
            out_specs=pl.BlockSpec((1, 1), lambda i: (0, 0)),
            scratch_shapes=[pltpu.VMEM((_SUBLANES, _LANES), jnp.float32)],
        ),
        compiler_params=pltpu.CompilerParams(
            dimension_semantics=("arbitrary",),  # sequential reduction axis
        ),
        cost_estimate=cost,
    )(yf, xf)

    return out[0, 0]


if __name__ == "__main__":
    key = jax.random.PRNGKey(0)
    k1, k2 = jax.random.split(key)

    # Small image-like predictions/targets: (batch=2, channels=4, 16x16).
    shape = (2, 4, 16, 16)
    yhat = jax.random.normal(k1, shape, dtype=jnp.float32)
    y = jax.random.normal(k2, shape, dtype=jnp.float32)

    result = rmse_loss(yhat, y)
    result = jax.block_until_ready(result)

    # Reference check in plain JAX.
    ref = jnp.sqrt(jnp.mean((yhat - y) ** 2))
    assert jnp.allclose(result, ref, rtol=1e-5, atol=1e-6), (result, ref)

    print("KERNEL_OK")
</pallas_src>

<mosaic_0001>
module attributes {stable_mosaic.version = 11 : i64} {
  func.func @_rmse_kernel(%arg0: i32, %arg1: memref<16x128xf32, #tpu.memory_space<vmem>>, %arg2: memref<16x128xf32, #tpu.memory_space<vmem>>, %arg3: memref<1x1xf32, #tpu.memory_space<vmem>>, %arg4: memref<8x128xf32, #tpu.memory_space<vmem>>) attributes {dimension_semantics = [#tpu.dimension_semantics<arbitrary>], iteration_bounds = array<i64: 1>, scalar_prefetch = 0 : i64, scratch_operands = 1 : i64, tpu.core_type = #tpu.core_type<tc>, window_params = [{transform_indices = @transform_0, window_bounds = array<i64: 16, 128>}, {transform_indices = @transform_1, window_bounds = array<i64: 16, 128>}, {pipeline_mode = #tpu.pipeline_mode<synchronous>, transform_indices = @transform_2, window_bounds = array<i64: 1, 1>}]} {
    %c0_i32 = arith.constant 0 : i32
    %0 = arith.cmpi eq, %arg0, %c0_i32 : i32
    %1 = arith.extui %0 : i1 to i32
    %c0_i32_0 = arith.constant 0 : i32
    %2 = arith.cmpi ne, %1, %c0_i32_0 : i32
    scf.if %2 {
      %cst_10 = arith.constant 0.000000e+00 : f32
      %15 = vector.broadcast %cst_10 : f32 to vector<8x128xf32>
      %c0_11 = arith.constant 0 : index
      %c0_12 = arith.constant 0 : index
      %16 = vector.load %arg4[%c0_11, %c0_12] : memref<8x128xf32, #tpu.memory_space<vmem>>, vector<8x128xf32>
      tpu.vector_store %arg4[%c0_11, %c0_12], %15 {strides = array<i32>} : memref<8x128xf32, #tpu.memory_space<vmem>>, vector<8x128xf32>,
    } else {
    }
    %c0 = arith.constant 0 : index
    %c0_1 = arith.constant 0 : index
    %3 = vector.load %arg1[%c0, %c0_1] : memref<16x128xf32, #tpu.memory_space<vmem>>, vector<16x128xf32>
    %c0_2 = arith.constant 0 : index
    %c0_3 = arith.constant 0 : index
    %4 = vector.load %arg2[%c0_2, %c0_3] : memref<16x128xf32, #tpu.memory_space<vmem>>, vector<16x128xf32>
    %5 = arith.subf %3, %4 : vector<16x128xf32>
    %6 = arith.mulf %5, %5 : vector<16x128xf32>
    %c0_4 = arith.constant 0 : index
    %c0_5 = arith.constant 0 : index
    %7 = vector.load %arg4[%c0_4, %c0_5] : memref<8x128xf32, #tpu.memory_space<vmem>>, vector<8x128xf32>
    %8 = vector.shape_cast %6 : vector<16x128xf32> to vector<2x8x128xf32>
    %cst = arith.constant dense<0.000000e+00> : vector<8x128xf32>
    %9 = vector.multi_reduction <add>, %8, %cst [0] : vector<2x8x128xf32> to vector<8x128xf32>
    %10 = arith.addf %7, %9 : vector<8x128xf32>
    %c0_6 = arith.constant 0 : index
    %c0_7 = arith.constant 0 : index
    %11 = vector.load %arg4[%c0_6, %c0_7] : memref<8x128xf32, #tpu.memory_space<vmem>>, vector<8x128xf32>
    tpu.vector_store %arg4[%c0_6, %c0_7], %10 {strides = array<i32>} : memref<8x128xf32, #tpu.memory_space<vmem>>, vector<8x128xf32>,
    %c0_i32_8 = arith.constant 0 : i32
    %12 = arith.cmpi eq, %arg0, %c0_i32_8 : i32
    %13 = arith.extui %12 : i1 to i32
    %c0_i32_9 = arith.constant 0 : i32
    %14 = arith.cmpi ne, %13, %c0_i32_9 : i32
    scf.if %14 {
      %c0_10 = arith.constant 0 : index
      %c0_11 = arith.constant 0 : index
      %15 = vector.load %arg4[%c0_10, %c0_11] : memref<8x128xf32, #tpu.memory_space<vmem>>, vector<8x128xf32>
      %16 = vector.shape_cast %15 : vector<8x128xf32> to vector<1x8x128xf32>
      %cst_12 = arith.constant dense<0.000000e+00> : vector<1xf32>
      %17 = vector.multi_reduction <add>, %16, %cst_12 [1, 2] : vector<1x8x128xf32> to vector<1xf32>
      %18 = vector.shape_cast %17 : vector<1xf32> to vector<1x1x1xf32>
      %19 = vector.extract %18[0, 0, 0] : f32 from vector<1x1x1xf32>
      %cst_13 = arith.constant 2.048000e+03 : f32
      %20 = arith.divf %19, %cst_13 : f32
      %21 = math.sqrt %20 : f32
      %22 = vector.broadcast %21 : f32 to vector<1x1xf32>
      %c0_14 = arith.constant 0 : index
      %c0_15 = arith.constant 0 : index
      %23 = vector.load %arg3[%c0_14, %c0_15] : memref<1x1xf32, #tpu.memory_space<vmem>>, vector<1x1xf32>
      tpu.vector_store %arg3[%c0_14, %c0_15], %22 {strides = array<i32>} : memref<1x1xf32, #tpu.memory_space<vmem>>, vector<1x1xf32>,
    } else {
    }
    return
  }
  func.func @transform_0(%arg0: i32) -> (i32, i32) {
    %c0_i32 = arith.constant 0 : i32
    %c0_i32_0 = arith.constant 0 : i32
    return %arg0, %c0_i32 : i32, i32
  }
  func.func @transform_1(%arg0: i32) -> (i32, i32) {
    %c0_i32 = arith.constant 0 : i32
    %c0_i32_0 = arith.constant 0 : i32
    return %arg0, %c0_i32 : i32, i32
  }
  func.func @transform_2(%arg0: i32) -> (i32, i32) {
    %c0_i32 = arith.constant 0 : i32
    %c0_i32_0 = arith.constant 0 : i32
    %c0_i32_1 = arith.constant 0 : i32
    return %c0_i32, %c0_i32_0 : i32, i32
  }
}

</mosaic_0001>

<bundles_post_ra>
// kernel: tpu_custom_call.1
= control target key start
LH: loop header
LB: loop body
LE: loop exit
PB: predicated region body
PF: predicated region fallthrough
CT: control target
= control target key end

     0   :  { %7 = vsyncpa [#allocation4], 0  ;;  %s242_s0 = inlined_call_operand.hbm [shape: f32[16,128], index: 0, kind: input, shape index: {}]   ;;  %s243_s1 = inlined_call_operand.hbm [shape: f32[16,128], index: 1, kind: input, shape index: {}]   ;;  %s244_s2 = inlined_call_operand.hbm [shape: f32[1,1], index: 2, kind: output, shape index: {}]  }
   0x1   :  { %8 = vsyncpa [#allocation7], 0 }
   0x2   :  { %9 = vsyncpa [#allocation5], 0  ;;  %s14_s11 = sshll.u32 %s242_s0, 4  ;;  %s212_s12 = smov [#allocation3]   ;;  %s15_s11 = int_to_ptr.hbm [resolvable:$true] %s14_s11 }
   0x3   :  { %s16_s13 = sshll.u32 %s212_s12, 4  ;;  %s27_s16 = sshll.u32 %s243_s1, 4  ;;  %s17_s13 = int_to_ptr.vmem [resolvable:$true] %s16_s13  ;;  %s28_s16 = int_to_ptr.hbm [resolvable:$true] %s27_s16 }
   0x4   :  { %s213_s17 = smov 128   ;;  %s214_s18 = smov 8  }
   0x5   :  { %22 = dma.hbm_to_vmem [thread:$0]  %s15_s11, 256, %s17_s13, [#allocation4], %s213_s17, %s213_s17, %s214_s18  }
   0x6   :  { %s215_s19 = smov [#allocation6]  }
   0x7   :  { %s29_s20 = sshll.u32 %s215_s19, 4  ;;  %s30_s20 = int_to_ptr.vmem [resolvable:$true] %s29_s20 }
   0x8   :  { %35 = dma.hbm_to_vmem [thread:$0]  %s28_s16, 256, %s30_s20, [#allocation7], %s213_s17, %s213_s17, %s214_s18  }
   0x9   :  { %206 = dma.done.wait [#allocation4], 256  }
   0xa   :  { %207 = vsyncadd [#allocation4], 4294967040 }
   0xb   :  { %208 = dma.done.wait [#allocation7], 256  }
   0xc   :  { %209 = vsyncadd [#allocation7], 4294967040  ;;  %v49_v0 = vld [vmem:[#allocation3] sm:$0xff]  ;;  %v50_v1 = vld [vmem:[#allocation3 + $0x8] sm:$0xff]  ;;  %v216_v9 = vmov 2048.0   ;;  %s217_s22 = smov [#allocation8]  }
   0xd   :  { %v51_v2 = vld [vmem:[#allocation6] sm:$0xff]  ;;  %v52_v3 = vld [vmem:[#allocation6 + $0x8] sm:$0xff]  ;;  %130 = vrcp.f32 %v216_v9  ;;  %s105_s23 = sshll.u32 %s217_s22, 4  ;;  %s107_s26 = sshll.u32 %s244_s2, 4  ;;  %vm98_vm3 = vcmask 0   ;;  %s106_s23 = int_to_ptr.vmem [resolvable:$true] %s105_s23  ;;  %s108_s26 = int_to_ptr.hbm [resolvable:$true] %s107_s26 }
   0xe   :  { %v53_v4 = vsub.f32 %v49_v0, %v51_v2  ;;  %v54_v5 = vsub.f32 %v50_v1, %v52_v3 }
  0x10   :  { %v55_v6 = vmul.f32 %v53_v4, %v53_v4  ;;  %v56_v7 = vmul.f32 %v54_v5, %v54_v5 }
  0x12   :  { %v58_v8 = vadd.f32 %v56_v7, %v55_v6 }
  0x13   :  { %v131_v10 = vpop.eup %130 }
  0x14   :  { %65 = vadd.xlane.f32.xlu0 %v58_v8  ;;  %v75_v11 = vmul.f32 2048.0, %v131_v10  ;;  %vm79_vm0 = vweird.f32 %v131_v10 }
  0x16   :  { %v76_v12 = vsub.f32 1.0, %v75_v11 }
  0x18   :  { %v77_v16 = vmul.f32 %v131_v10, %v76_v12 }
  0x1a   :  { %v78_v19 = vadd.f32 %v131_v10, %v77_v16 }
  0x1c   :  { %v80_v22 = vsel %vm79_vm0, %v131_v10, %v78_v19 }
  0x87   :  { %v66_v13 = vpop.xlane.xlu0 %65 }
  0x88   :  { %v67_v14 = vrot.slane %v66_v13, 4 }
  0x8a   :  { %v68_v15 = vadd.f32 %v67_v14, %v66_v13 }
  0x8c   :  { %v69_v17 = vrot.slane %v68_v15, 2 }
  0x8e   :  { %v70_v18 = vadd.f32 %v69_v17, %v68_v15 }
  0x90   :  { %v71_v20 = vrot.slane %v70_v18, 1 }
  0x92   :  { %v72_v21 = vadd.f32 %v71_v20, %v70_v18 }
  0x94   :  { %118 = vpush %v72_v21 }
  0x95   :  { %120 = vpush %v80_v22 }
  0xc5   :  { %s119_s0 = spop %118 }
  0xc6   :  { %s121_s1 = spop %120 }
  0xc7   :  { %s82_s21 = smul.f32 %s121_s1, %s119_s0 }
  0xc9   :  { %v83_v23 = vstv %s82_s21 }
  0xca   :  { %132 = vrsqrt.f32 %v83_v23  ;;  %vm91_vm1 = vcmp.eq.f32.partialorder %v83_v23, inf  ;;  %v94_v31 = vand.u32 2147483648, %v83_v23  ;;  %vm93_vm2 = vcmp.eq.f32.partialorder %v83_v23, 0.0 }
  0xd0   :  { %v133_v24 = vpop.eup %132 }
  0xd1   :  { %v85_v25 = vmul.f32 %v133_v24, %v83_v23 }
  0xd3   :  { %v86_v26 = vmul.f32 %v133_v24, %v85_v25 }
  0xd5   :  { %v87_v27 = vmul.f32 0.5, %v86_v26 }
  0xd7   :  { %v88_v28 = vsub.f32 1.5, %v87_v27 }
  0xd9   :  { %v89_v29 = vmul.f32 %v133_v24, %v88_v28 }
  0xdb   :  { %v90_v30 = vmul.f32 %v89_v29, %v83_v23 }
  0xdd   :  { %v92_v32 = vsel %vm91_vm1, %v83_v23, %v90_v30 }
  0xde   :  { %v95_v33 = vsel %vm93_vm2, %v94_v31, %v92_v32 }
  0xdf   :  { %122 = vpush %v95_v33 }
 0x110   :  { %s123_s27 = spop %122 }
 0x111   :  { %v97_v34 = vstv %s123_s27 }
 0x112   :  { %99 = vst.msk [vmem:[#allocation8] sm:$0x1] %vm98_vm3, %v97_v34 }
 0x113   :  { %110 = dma.vmem_to_hbm [thread:$0]  %s106_s23, 16, %s108_s26, [#allocation5]  }
 0x114   :  { %210 = dma.done.wait [#allocation5], 16  }
 0x115   :  { %211 = vsyncadd [#allocation5], 4294967280 }
 0x116   :  { %115 = vsyncpa [#allocation4], 1 }
 0x117   :  { %116 = vsyncpa [#allocation7], 1 }
 0x118   :  { %117 = vsyncpa [#allocation5], 1 }

</bundles_post_ra>
